<compile_context>
chip_gen: v7x
topology: tpu7x:2x2x1
jax: 0.10.0
libtpu: 0.0.40
codegen_flags: <defaults>
</compile_context>

<pallas_src>
import functools

import jax
import jax.numpy as jnp
from jax.experimental import pallas as pl
from jax.experimental.pallas import tpu as pltpu


def _round_up(a, b):
    return (a + b - 1) // b * b


def _voxel_update_kernel(x_ref, w1_ref, b1_ref, w2_ref, b2_ref, w3_ref, o_ref):
    """Fused 1x1x1-conv MLP on one (C_in, TV) voxel tile (channels x voxels).

    Weights arrive pre-cast to bf16; the activation tile is cast here.  All
    matmuls accumulate in f32; bias add and LeakyReLU run in f32.
    """
    x = x_ref[0].astype(jnp.bfloat16)  # (C_in, TV): channels on sublanes, voxels on lanes

    # Layer 1: conv1x1 (W1 @ x) + bias + LeakyReLU(0.2)
    h = jnp.dot(w1_ref[...], x, preferred_element_type=jnp.float32) + b1_ref[...]
    h = jnp.where(h > 0, h, 0.2 * h)

    # Layer 2: conv1x1 + bias + LeakyReLU(0.2)
    h = jnp.dot(w2_ref[...], h.astype(jnp.bfloat16),
                preferred_element_type=jnp.float32) + b2_ref[...]
    h = jnp.where(h > 0, h, 0.2 * h)

    # Layer 3: conv1x1, no bias.  (C_out, TV) store: voxel axis on lanes
    # (multiple of 128) -> lane-dense, unmasked vst (ragged last block masked
    # by Pallas automatically).
    out = jnp.dot(w3_ref[...], h.astype(jnp.bfloat16),
                  preferred_element_type=jnp.float32)
    o_ref[0] = out.astype(o_ref.dtype)


@functools.partial(jax.jit, static_argnames=("tv",))
def voxel_update_net(x, w1, b1, w2, b2, w3, *, tv=8192):
    """Forward pass.

    x:  (N, C_in, D, H, W) float32, NCDHW (PyTorch layout).
    w*: conv weights in PyTorch (out_c, in_c) layout (kernel dims squeezed).
    b*: biases with shape (out_c, 1) so they broadcast along the voxel lanes.
    Returns (N, C_out, D, H, W) float32.
    """
    N, C_in, D, H, W = x.shape
    C_h1 = w1.shape[0]
    C_h2 = w2.shape[0]
    C_out = w3.shape[0]
    V = D * H * W

    # NCDHW -> (N, C, V) is a contiguous reshape: no transpose, no HBM copy.
    x_r = x.reshape(N, C_in, V)

    # Voxel tile: multiple of 128 (lane width); shrink toward V if V is small
    # so we don't DMA/compute huge amounts of padding.  No host-side padding:
    # the final ragged block is handled by Pallas (padded reads, masked
    # stores).
    tv = _round_up(tv, 128)
    tv_eff = min(tv, _round_up(V, 128))
    grid = (N, pl.cdiv(V, tv_eff))

    # MXU operands in bf16 (f32 accumulate); biases stay f32.
    w1b = w1.astype(jnp.bfloat16)
    w2b = w2.astype(jnp.bfloat16)
    w3b = w3.astype(jnp.bfloat16)
    b1f = b1.astype(jnp.float32)
    b2f = b2.astype(jnp.float32)

    flops = 2 * N * V * (C_in * C_h1 + C_h1 * C_h2 + C_h2 * C_out)
    bytes_accessed = (x.dtype.itemsize * N * V * C_in          # activation read
                      + 4 * N * V * C_out                      # output write
                      + 2 * (w1.size + w2.size + w3.size)      # bf16 weights
                      + 4 * (b1.size + b2.size))
    cost = pl.CostEstimate(flops=flops, bytes_accessed=bytes_accessed,
                           transcendentals=0)

    out = pl.pallas_call(
        _voxel_update_kernel,
        out_shape=jax.ShapeDtypeStruct((N, C_out, V), x.dtype),
        grid_spec=pltpu.PrefetchScalarGridSpec(
            num_scalar_prefetch=0,
            grid=grid,
            in_specs=[
                pl.BlockSpec((1, C_in, tv_eff), lambda n, i: (n, 0, i)),  # x tile
                pl.BlockSpec((C_h1, C_in), lambda n, i: (0, 0)),          # W1 (VMEM-resident)
                pl.BlockSpec((C_h1, 1), lambda n, i: (0, 0)),             # b1
                pl.BlockSpec((C_h2, C_h1), lambda n, i: (0, 0)),          # W2
                pl.BlockSpec((C_h2, 1), lambda n, i: (0, 0)),             # b2
                pl.BlockSpec((C_out, C_h2), lambda n, i: (0, 0)),         # W3
            ],
            out_specs=pl.BlockSpec((1, C_out, tv_eff), lambda n, i: (n, 0, i)),
        ),
        compiler_params=pltpu.CompilerParams(
            dimension_semantics=("parallel", "parallel"),
            # Headroom for TV=8192 (and room for 16384 on v6e/v7x); explicit
            # so v5e's 16 MiB scoped default doesn't constrain the tile.
            vmem_limit_bytes=32 * 1024 * 1024,
        ),
        cost_estimate=cost,
    )(x_r, w1b, b1f, w2b, b2f, w3b)

    # (N, C_out, V) -> NCDHW, a free contiguous reshape.
    return out.reshape(N, C_out, D, H, W)


def init_params(key, num_channels=16, num_perceptions=3, channel_dims=(64, 64),
                normal_std=0.02, zero_bias=True):
    """Deterministic init matching nn.init.normal_(std=0.02), zero biases.

    Weights are kept in the PyTorch Conv3d layout (out_c, in_c) (kernel dims
    squeezed), which is exactly what the kernel's `W @ x` formulation needs.
    Biases are shaped (out_c, 1) to broadcast along the voxel (lane) axis.
    """
    c_in = num_channels * num_perceptions
    dims = [c_in] + list(channel_dims) + [num_channels]
    keys = jax.random.split(key, len(dims) - 1)

    ws = []
    for li in range(len(dims) - 1):
        fan_in, fan_out = dims[li], dims[li + 1]
        w = normal_std * jax.random.normal(keys[li], (fan_out, fan_in),
                                           dtype=jnp.float32)
        ws.append(w)
    w1, w2, w3 = ws

    b1 = jnp.zeros((dims[1], 1), dtype=jnp.float32)
    b2 = jnp.zeros((dims[2], 1), dtype=jnp.float32)
    if not zero_bias:
        bkeys = jax.random.split(jax.random.fold_in(key, 123), 2)
        b1 = normal_std * jax.random.normal(bkeys[0], (dims[1], 1), jnp.float32)
        b2 = normal_std * jax.random.normal(bkeys[1], (dims[2], 1), jnp.float32)
    return w1, b1, w2, b2, w3


def _reference(x, w1, b1, w2, b2, w3, *, bf16=False):
    """Plain-JAX reference (channels-last matmuls).

    bf16=True mirrors the kernel's numerics (bf16 operands, f32 accumulate)
    for a tight check; bf16=False is the faithful f32 PyTorch semantics.
    """
    def cast(a):
        return a.astype(jnp.bfloat16) if bf16 else a

    N, C_in, D, H, W = x.shape
    xf = jnp.transpose(x, (0, 2, 3, 4, 1)).reshape(-1, C_in)
    h = jnp.dot(cast(xf), cast(w1).T, preferred_element_type=jnp.float32) + b1[:, 0]
    h = jnp.where(h > 0, h, 0.2 * h)
    h = jnp.dot(cast(h), cast(w2).T, preferred_element_type=jnp.float32) + b2[:, 0]
    h = jnp.where(h > 0, h, 0.2 * h)
    y = jnp.dot(cast(h), cast(w3).T, preferred_element_type=jnp.float32)
    y = y.reshape(N, D, H, W, -1)
    return jnp.transpose(y, (0, 4, 1, 2, 3))


if __name__ == "__main__":
    key = jax.random.PRNGKey(0)
    k_param, k_x = jax.random.split(key)

    num_channels = 16
    num_perceptions = 3
    N, D, H, W = 2, 8, 8, 8                 # V = 512 voxels per batch element
    C_in = num_channels * num_perceptions   # 48

    w1, b1, w2, b2, w3 = init_params(k_param, num_channels, num_perceptions)
    x = jax.random.normal(k_x, (N, C_in, D, H, W), dtype=jnp.float32)

    out = voxel_update_net(x, w1, b1, w2, b2, w3)
    out = jax.block_until_ready(out)
    assert out.shape == (N, num_channels, D, H, W), out.shape

    # Tight check vs a reference with matching bf16-matmul / f32-accumulate
    # numerics (verifies the kernel's math / tiling / ragged handling).
    ref_bf16 = _reference(x, w1, b1, w2, b2, w3, bf16=True)
    assert jnp.allclose(out, ref_bf16, atol=1e-4, rtol=1e-2), \
        "mismatch vs bf16-matched reference"

    # Looser check vs the faithful f32 PyTorch semantics: bounds the bf16
    # matmul divergence (std-0.02 weights keep activations small, so the
    # absolute error from bf16 operands is well under 1e-3 here).
    ref_f32 = _reference(x, w1, b1, w2, b2, w3, bf16=False)
    assert jnp.allclose(out, ref_f32, atol=2e-3, rtol=5e-2), \
        "mismatch vs f32 reference"

    print("KERNEL_OK")
</pallas_src>

<mosaic_0001>
module attributes {stable_mosaic.version = 11 : i64} {
  func.func @_voxel_update_kernel(%arg0: i32, %arg1: i32, %arg2: memref<1x48x512xf32, #tpu.memory_space<vmem>>, %arg3: memref<64x48xbf16, #tpu.memory_space<vmem>>, %arg4: memref<64x1xf32, #tpu.memory_space<vmem>>, %arg5: memref<64x64xbf16, #tpu.memory_space<vmem>>, %arg6: memref<64x1xf32, #tpu.memory_space<vmem>>, %arg7: memref<16x64xbf16, #tpu.memory_space<vmem>>, %arg8: memref<1x16x512xf32, #tpu.memory_space<vmem>>) attributes {dimension_semantics = [#tpu.dimension_semantics<parallel>, #tpu.dimension_semantics<parallel>], iteration_bounds = array<i64: 2, 1>, scalar_prefetch = 0 : i64, scratch_operands = 0 : i64, tpu.core_type = #tpu.core_type<tc>, window_params = [{transform_indices = @transform_0, window_bounds = array<i64: 1, 48, 512>}, {pipeline_mode = #tpu.pipeline_mode<synchronous>, transform_indices = @transform_1, window_bounds = array<i64: 64, 48>}, {pipeline_mode = #tpu.pipeline_mode<synchronous>, transform_indices = @transform_2, window_bounds = array<i64: 64, 1>}, {pipeline_mode = #tpu.pipeline_mode<synchronous>, transform_indices = @transform_3, window_bounds = array<i64: 64, 64>}, {pipeline_mode = #tpu.pipeline_mode<synchronous>, transform_indices = @transform_4, window_bounds = array<i64: 64, 1>}, {pipeline_mode = #tpu.pipeline_mode<synchronous>, transform_indices = @transform_5, window_bounds = array<i64: 16, 64>}, {transform_indices = @transform_6, window_bounds = array<i64: 1, 16, 512>}]} {
    %c0 = arith.constant 0 : index
    %c0_0 = arith.constant 0 : index
    %c0_1 = arith.constant 0 : index
    %0 = vector.load %arg2[%c0, %c0_0, %c0_1] : memref<1x48x512xf32, #tpu.memory_space<vmem>>, vector<1x48x512xf32>
    %1 = vector.shape_cast %0 : vector<1x48x512xf32> to vector<48x512xf32>
    %2 = arith.truncf %1 : vector<48x512xf32> to vector<48x512xbf16>
    %c0_2 = arith.constant 0 : index
    %c0_3 = arith.constant 0 : index
    %3 = vector.load %arg3[%c0_2, %c0_3] : memref<64x48xbf16, #tpu.memory_space<vmem>>, vector<64x48xbf16>
    %cst = arith.constant dense<0.000000e+00> : vector<64x512xf32>
    %4 = tpu.matmul %3, %2, %cst {dimension_numbers = #tpu.dot_dimension_numbers<[1], [0], [0], [1], [0, 0, 1, 1], [], []>} : vector<64x48xbf16>, vector<48x512xbf16>, vector<64x512xf32> -> vector<64x512xf32>
    %c0_4 = arith.constant 0 : index
    %c0_5 = arith.constant 0 : index
    %5 = vector.load %arg4[%c0_4, %c0_5] : memref<64x1xf32, #tpu.memory_space<vmem>>, vector<64x1xf32>
    %6 = vector.broadcast %5 : vector<64x1xf32> to vector<64x512xf32>
    %7 = arith.addf %4, %6 : vector<64x512xf32>
    %cst_6 = arith.constant 0.000000e+00 : f32
    %8 = vector.broadcast %cst_6 : f32 to vector<64x512xf32>
    %9 = arith.cmpf ogt, %7, %8 : vector<64x512xf32>
    %cst_7 = arith.constant 2.000000e-01 : f32
    %10 = vector.broadcast %cst_7 : f32 to vector<64x512xf32>
    %11 = arith.mulf %10, %7 : vector<64x512xf32>
    %12 = arith.select %9, %7, %11 : vector<64x512xi1>, vector<64x512xf32>
    %c0_8 = arith.constant 0 : index
    %c0_9 = arith.constant 0 : index
    %13 = vector.load %arg5[%c0_8, %c0_9] : memref<64x64xbf16, #tpu.memory_space<vmem>>, vector<64x64xbf16>
    %14 = arith.truncf %12 : vector<64x512xf32> to vector<64x512xbf16>
    %cst_10 = arith.constant dense<0.000000e+00> : vector<64x512xf32>
    %15 = tpu.matmul %13, %14, %cst_10 {dimension_numbers = #tpu.dot_dimension_numbers<[1], [0], [0], [1], [0, 0, 1, 1], [], []>} : vector<64x64xbf16>, vector<64x512xbf16>, vector<64x512xf32> -> vector<64x512xf32>
    %c0_11 = arith.constant 0 : index
    %c0_12 = arith.constant 0 : index
    %16 = vector.load %arg6[%c0_11, %c0_12] : memref<64x1xf32, #tpu.memory_space<vmem>>, vector<64x1xf32>
    %17 = vector.broadcast %16 : vector<64x1xf32> to vector<64x512xf32>
    %18 = arith.addf %15, %17 : vector<64x512xf32>
    %cst_13 = arith.constant 0.000000e+00 : f32
    %19 = vector.broadcast %cst_13 : f32 to vector<64x512xf32>
    %20 = arith.cmpf ogt, %18, %19 : vector<64x512xf32>
    %cst_14 = arith.constant 2.000000e-01 : f32
    %21 = vector.broadcast %cst_14 : f32 to vector<64x512xf32>
    %22 = arith.mulf %21, %18 : vector<64x512xf32>
    %23 = arith.select %20, %18, %22 : vector<64x512xi1>, vector<64x512xf32>
    %c0_15 = arith.constant 0 : index
    %c0_16 = arith.constant 0 : index
    %24 = vector.load %arg7[%c0_15, %c0_16] : memref<16x64xbf16, #tpu.memory_space<vmem>>, vector<16x64xbf16>
    %25 = arith.truncf %23 : vector<64x512xf32> to vector<64x512xbf16>
    %cst_17 = arith.constant dense<0.000000e+00> : vector<16x512xf32>
    %26 = tpu.matmul %24, %25, %cst_17 {dimension_numbers = #tpu.dot_dimension_numbers<[1], [0], [0], [1], [0, 0, 1, 1], [], []>} : vector<16x64xbf16>, vector<64x512xbf16>, vector<16x512xf32> -> vector<16x512xf32>
    %c0_18 = arith.constant 0 : index
    %c0_19 = arith.constant 0 : index
    %c0_20 = arith.constant 0 : index
    %27 = vector.load %arg8[%c0_18, %c0_19, %c0_20] : memref<1x16x512xf32, #tpu.memory_space<vmem>>, vector<1x16x512xf32>
    %28 = vector.shape_cast %27 : vector<1x16x512xf32> to vector<16x512xf32>
    %29 = vector.shape_cast %26 : vector<16x512xf32> to vector<1x16x512xf32>
    tpu.vector_store %arg8[%c0_18, %c0_19, %c0_20], %29 {strides = array<i32>} : memref<1x16x512xf32, #tpu.memory_space<vmem>>, vector<1x16x512xf32>,
    return
  }
  func.func @transform_0(%arg0: i32, %arg1: i32) -> (i32, i32, i32) {
    %c0_i32 = arith.constant 0 : i32
    %c0_i32_0 = arith.constant 0 : i32
    return %arg0, %c0_i32, %arg1 : i32, i32, i32
  }
  func.func @transform_1(%arg0: i32, %arg1: i32) -> (i32, i32) {
    %c0_i32 = arith.constant 0 : i32
    %c0_i32_0 = arith.constant 0 : i32
    %c0_i32_1 = arith.constant 0 : i32
    return %c0_i32, %c0_i32_0 : i32, i32
  }
  func.func @transform_2(%arg0: i32, %arg1: i32) -> (i32, i32) {
    %c0_i32 = arith.constant 0 : i32
    %c0_i32_0 = arith.constant 0 : i32
    %c0_i32_1 = arith.constant 0 : i32
    return %c0_i32, %c0_i32_0 : i32, i32
  }
  func.func @transform_3(%arg0: i32, %arg1: i32) -> (i32, i32) {
    %c0_i32 = arith.constant 0 : i32
    %c0_i32_0 = arith.constant 0 : i32
    %c0_i32_1 = arith.constant 0 : i32
    return %c0_i32, %c0_i32_0 : i32, i32
  }
  func.func @transform_4(%arg0: i32, %arg1: i32) -> (i32, i32) {
    %c0_i32 = arith.constant 0 : i32
    %c0_i32_0 = arith.constant 0 : i32
    %c0_i32_1 = arith.constant 0 : i32
    return %c0_i32, %c0_i32_0 : i32, i32
  }
  func.func @transform_5(%arg0: i32, %arg1: i32) -> (i32, i32) {
    %c0_i32 = arith.constant 0 : i32
    %c0_i32_0 = arith.constant 0 : i32
    %c0_i32_1 = arith.constant 0 : i32
    return %c0_i32, %c0_i32_0 : i32, i32
  }
  func.func @transform_6(%arg0: i32, %arg1: i32) -> (i32, i32, i32) {
    %c0_i32 = arith.constant 0 : i32
    %c0_i32_0 = arith.constant 0 : i32
    return %arg0, %c0_i32, %arg1 : i32, i32, i32
  }
}

</mosaic_0001>

<bundles_post_ra>
// kernel: voxel_update_net.1
= control target key start
LH: loop header
LB: loop body
LE: loop exit
PB: predicated region body
PF: predicated region fallthrough
CT: control target
= control target key end

     0   :  { %s1348_s21 = smov 0   ;;  %s1350_s22 = smov 0   ;;  %s1636_s0 = inlined_call_operand.vmem [shape: f32[2,48,512], index: 0, kind: input, shape index: {}]   ;;  %s1637_s1 = inlined_call_operand.vmem [shape: bf16[64,48], index: 1, kind: input, shape index: {}]   ;;  %s1638_s2 = inlined_call_operand.vmem [shape: f32[64,1], index: 2, kind: input, shape index: {}]   ;;  %s1639_s3 = inlined_call_operand.vmem [shape: bf16[64,64], index: 3, kind: input, shape index: {}]   ;;  %s1640_s4 = inlined_call_operand.vmem [shape: f32[64,1], index: 4, kind: input, shape index: {}]   ;;  %s1641_s5 = inlined_call_operand.vmem [shape: bf16[16,64], index: 5, kind: input, shape index: {}]   ;;  %s1642_s6 = inlined_call_operand.vmem [shape: f32[2,16,512], index: 6, kind: output, shape index: {}]  }
   0x1   :  { %s1352_s23 = smov 0  }
   0x2 LB: > { %s28_s24 = sadd.s32 1, %s1306_s22  ;;  %p1217_p0 = scmp.ge.s32.totalorder %s1310_s23, 1  ;;  %s1310_s23 = sphi %s1352_s23, %s16_s23   ;;  %s1306_s22 = sphi %s1350_s22, %s1644_s22   ;;  %s1302_s21 = sphi %s1348_s21, %s1643_s21  }
   0x3   : > { %p30_p1 = scmp.ge.s32.totalorder %s28_s24, 2  ;;  %p233_p2 = scmp.lt.s32.totalorder %s1310_s23, 3 }
   0x5   : > { %s1646_s24 = smov (%p30_p1, %s28_s24), 0  ;;  %p234_p3 = pnand %p1217_p0, %p233_p2 }
   0x6   : > { %p272_p4 = scmp.lt.s32.totalorder (!%p234_p3), %s1302_s21, 1  ;;  %v1312_v0 = vmov (!%p234_p3), 0   ;;  %v336_v1 = vld [vmem:[%s1638_s2] sm:$0xff] (!%p234_p3)  ;;  %v338_v2 = vld [vmem:[%s1638_s2 + $0x10] sm:$0xff] (!%p234_p3)  ;;  %v337_v3 = vld [vmem:[%s1638_s2 + $0x8] sm:$0xff] (!%p234_p3)  ;;  %vm404_vm0 = vcmask (!%p234_p3), 392192  }
   0x7   : > { %237 = sbr.rel (%p234_p3) target bundleno = 764 (0x2fc), region = 44  ;;  %449 = vmatprep.mubr.bf16.mxu0 (!%p234_p3), %v1312_v0  ;;  %522 = vmatprep.mubr.bf16.mxu1 (!%p234_p3), %v1312_v0  ;;  %v339_v4 = vld [vmem:[%s1638_s2 + $0x18] sm:$0xff] (!%p234_p3)  ;;  %v340_v17 = vld [vmem:[%s1638_s2 + $0x20] sm:$0xff] (!%p234_p3)  ;;  %v341_v18 = vld [vmem:[%s1638_s2 + $0x28] sm:$0xff] (!%p234_p3) }
   0x8   : > { %1277 = vset.pattern.permute.xlu0 (!%p234_p3), %v1312_v0  ;;  %1278 = vset.pattern.permute.xlu1 (!%p234_p3), %v1312_v0  ;;  %v342_v42 = vld [vmem:[%s1638_s2 + $0x30] sm:$0xff] (!%p234_p3)  ;;  %v343_v43 = vld [vmem:[%s1638_s2 + $0x38] sm:$0xff] (!%p234_p3)  ;;  %v1279_v45 = vld [vmem:[%s1637_s1] sm:$0xff] (!%p234_p3)  }
   0x9   : > { %346 = vperm.xlu0 (!%p234_p3), %1277, %v336_v1   ;;  %356 = vperm.xlu1 (!%p234_p3), %1278, %v338_v2   ;;  %v683_v46 = vld [vmem:[%s1640_s4] sm:$0xff] (!%p234_p3)  ;;  %v684_v47 = vld [vmem:[%s1640_s4 + $0x8] sm:$0xff] (!%p234_p3)  ;;  %v685_v48 = vld [vmem:[%s1640_s4 + $0x10] sm:$0xff] (!%p234_p3) }
   0xa   : > { %v686_v49 = vld [vmem:[%s1640_s4 + $0x18] sm:$0xff] (!%p234_p3)  ;;  %v1280_v50 = vld [vmem:[%s1637_s1 + $0x8] sm:$0xff] (!%p234_p3)   ;;  %v687_v51 = vld [vmem:[%s1640_s4 + $0x20] sm:$0xff] (!%p234_p3) }
   0xb   : > { %v688_v52 = vld [vmem:[%s1640_s4 + $0x28] sm:$0xff] (!%p234_p3)  ;;  %v689_v53 = vld [vmem:[%s1640_s4 + $0x30] sm:$0xff] (!%p234_p3)  ;;  %v690_v54 = vld [vmem:[%s1640_s4 + $0x38] sm:$0xff] (!%p234_p3) }
   0xc   : > { %v1281_v55 = vld [vmem:[%s1637_s1 + $0x10] sm:$0xff] (!%p234_p3)   ;;  %v1282_v56 = vld [vmem:[%s1637_s1 + $0x18] sm:$0xff] (!%p234_p3)  }
   0xd   : > { %351 = vperm.xlu0 (!%p234_p3), %1277, %v337_v3   ;;  %361 = vperm.xlu1 (!%p234_p3), %1278, %v339_v4  }
   0xe   : > { %s1648_s21 = smov (!%p272_p4, %s1302_s21), 1 }
   0xf   : > { %s1251_s25 = smul.u32 192, %s1648_s21  ;;  %s1250_s15 = sshll.u32 %s1648_s21, 6 }
  0x10   : > { %s289_s18 = scalar_lea.vmem %s1642_s6, %s1250_s15 }
  0x11   : > { %s1382_s8 = scalar_lea.vmem %s1636_s0, %s1251_s25  ;;  %366 = vperm.xlu0 %1277, %v340_v17   ;;  %371 = vperm.xlu1 %1278, %v341_v18  }
  0x12   : > { %v293_v5 = vld [vmem:[%s1382_s8 + $0x8] sm:$0xff]  ;;  %v295_v7 = vld [vmem:[%s1382_s8 + $0x18] sm:$0xff]  ;;  %v292_v10 = vld [vmem:[%s1382_s8] sm:$0xff] }
  0x13   : > { %v297_v6 = vld [vmem:[%s1382_s8 + $0x28] sm:$0xff]  ;;  %v299_v9 = vld [vmem:[%s1382_s8 + $0x38] sm:$0xff]  ;;  %v296_v11 = vld [vmem:[%s1382_s8 + $0x20] sm:$0xff] }
  0x14   : > { %v317_v8 = vpack.c.bf16 %v297_v6, %v293_v5  ;;  %v319_v12 = vpack.c.bf16 %v299_v9, %v295_v7  ;;  %v316_v13 = vpack.c.bf16 %v296_v11, %v292_v10  ;;  %v294_v14 = vld [vmem:[%s1382_s8 + $0x10] sm:$0xff]  ;;  %v301_v16 = vld [vmem:[%s1382_s8 + $0x48] sm:$0xff]  ;;  %v303_v21 = vld [vmem:[%s1382_s8 + $0x58] sm:$0xff] }
  0x15   : > { %v298_v15 = vld [vmem:[%s1382_s8 + $0x30] sm:$0xff]  ;;  %v305_v20 = vld [vmem:[%s1382_s8 + $0x68] sm:$0xff]  ;;  %v307_v22 = vld [vmem:[%s1382_s8 + $0x78] sm:$0xff]  ;;  %376 = vperm.xlu0 %1277, %v342_v42   ;;  %381 = vperm.xlu1 %1278, %v343_v43  }
  0x16   : > { %417 = vmatprep.subr.bf16.mxu0 %v317_v8  ;;  %v318_v19 = vpack.c.bf16 %v298_v15, %v294_v14  ;;  %490 = vmatprep.subr.bf16.mxu1 %v319_v12  ;;  %v321_v23 = vpack.c.bf16 %v305_v20, %v301_v16  ;;  %v323_v24 = vpack.c.bf16 %v307_v22, %v303_v21  ;;  %v300_v25 = vld [vmem:[%s1382_s8 + $0x40] sm:$0xff]  ;;  %v302_v27 = vld [vmem:[%s1382_s8 + $0x50] sm:$0xff]  ;;  %v309_v30 = vld [vmem:[%s1382_s8 + $0x88] sm:$0xff] }
  0x17   : > { %418 = vmatpush1.bf16.msra.mxu0 %v316_v13  ;;  %v304_v26 = vld [vmem:[%s1382_s8 + $0x60] sm:$0xff]  ;;  %v306_v29 = vld [vmem:[%s1382_s8 + $0x70] sm:$0xff]  ;;  %v313_v31 = vld [vmem:[%s1382_s8 + $0xa8] sm:$0xff] }
  0x18   : > { %491 = vmatpush1.bf16.msra.mxu1 %v318_v19  ;;  %v320_v28 = vpack.c.bf16 %v304_v26, %v300_v25  ;;  %419 = vmatprep.subr.bf16.mxu0 %v321_v23  ;;  %v322_v32 = vpack.c.bf16 %v306_v29, %v302_v27  ;;  %v325_v33 = vpack.c.bf16 %v313_v31, %v309_v30  ;;  %v311_v34 = vld [vmem:[%s1382_s8 + $0x98] sm:$0xff]  ;;  %v308_v36 = vld [vmem:[%s1382_s8 + $0x80] sm:$0xff]  ;;  %v310_v39 = vld [vmem:[%s1382_s8 + $0x90] sm:$0xff] }
  0x19   : > { %492 = vmatprep.subr.bf16.mxu1 %v323_v24  ;;  %v315_v35 = vld [vmem:[%s1382_s8 + $0xb8] sm:$0xff]  ;;  %v312_v38 = vld [vmem:[%s1382_s8 + $0xa0] sm:$0xff]  ;;  %v314_v40 = vld [vmem:[%s1382_s8 + $0xb0] sm:$0xff]  ;;  %693 = vperm.xlu0 %1277, %v683_v46  }
  0x1a   : > { %v327_v37 = vpack.c.bf16 %v315_v35, %v311_v34  ;;  %v324_v41 = vpack.c.bf16 %v312_v38, %v308_v36  ;;  %v326_v44 = vpack.c.bf16 %v314_v40, %v310_v39  ;;  %698 = vperm.xlu1 %1278, %v684_v47  }
  0x1b   : > { %420 = vmatpush1.bf16.msra.mxu0 %v320_v28 }
  0x1c   : > { %493 = vmatpush1.bf16.msra.mxu1 %v322_v32  ;;  %421 = vmatprep.subr.bf16.mxu0 %v325_v33 }
  0x1d   : > { %494 = vmatprep.subr.bf16.mxu1 %v327_v37  ;;  %703 = vperm.xlu0 %1277, %v685_v48  }
  0x1e   : > { %708 = vperm.xlu1 %1278, %v686_v49  }
  0x1f   : > { %422 = vmatpush1.bf16.msra.mxu0 %v324_v41 }
  0x20   : > { %495 = vmatpush1.bf16.msra.mxu1 %v326_v44 }
  0x21   : > { %713 = vperm.xlu0 %1277, %v687_v51  }
  0x22   : > { %1225 = vmatmul.mubr.msk.bf16.vlgmr.msra.gmra.mrb[0].mxu0 %vm404_vm0, %v1279_v45  ;;  %718 = vperm.xlu1 %1278, %v688_v52  }
  0x23   : > { %1229 = vmatmul.mubr.msk.bf16.vlgmr.msra.gmra.mrb[0].mxu1 %vm404_vm0, %v1279_v45  ;;  %459 = vmatprep.mubr.bf16.mxu0 %v1312_v0 }
  0x24   : > { %532 = vmatprep.mubr.bf16.mxu1 %v1312_v0 }
  0x25   : > { %723 = vperm.xlu0 %1277, %v689_v53  }
  0x26   : > { %728 = vperm.xlu1 %1278, %v690_v54  }
  0x2a   : > { %1226 = vmatmul.mubr.msk.bf16.gmra.mrb[4].mxu0 %vm404_vm0, %v1280_v50 }
  0x2b   : > { %1230 = vmatmul.mubr.msk.bf16.gmra.mrb[4].mxu1 %vm404_vm0, %v1280_v50  ;;  %469 = vmatprep.mubr.bf16.mxu0 %v1312_v0 }
  0x2c   : > { %542 = vmatprep.mubr.bf16.mxu1 %v1312_v0 }
  0x32   : > { %1227 = vmatmul.mubr.msk.bf16.gmra.mrb[8].mxu0 %vm404_vm0, %v1281_v55 }
  0x33   : > { %1231 = vmatmul.mubr.msk.bf16.gmra.mrb[8].mxu1 %vm404_vm0, %v1281_v55  ;;  %479 = vmatprep.mubr.bf16.mxu0 %v1312_v0 }
  0x34   : > { %552 = vmatprep.mubr.bf16.mxu1 %v1312_v0 }
  0x3a   : > { %1228 = vmatmul.mubr.msk.bf16.gmra.mrb[12].mxu0 %vm404_vm0, %v1282_v56 }
  0x3b   : > { %1232 = vmatmul.mubr.msk.bf16.gmra.mrb[12].mxu1 %vm404_vm0, %v1282_v56  ;;  %796 = vmatprep.mubr.bf16.mxu0 %v1312_v0 }
  0x3c   : > { %869 = vmatprep.mubr.bf16.mxu1 %v1312_v0 }
  0x88   : > { %v347_v57 = vpop.permute.xlu0 %346  ;;  %v357_v58 = vpop.permute.xlu1 %356 }
  0x8c   : > { %v352_v59 = vpop.permute.xlu0 %351  ;;  %v362_v23 = vpop.permute.xlu1 %361 }
  0x90   : > { %v367_v55 = vpop.permute.xlu0 %366  ;;  %v372_v56 = vpop.permute.xlu1 %371 }
  0xf5   : > { %v451_v60 = vpop.f32.mrb[0].mxu0 }
  0xf6   : > { %v452_v61 = vadd.f32 %v451_v60, %v347_v57  ;;  %v524_v62 = vpop.f32.mrb[0].mxu1  ;;  %v453_v63 = vpop.f32.mrb[1].mxu0 }
  0xf7   : > { %v525_v1 = vadd.f32 %v524_v62, %v347_v57  ;;  %v454_v2 = vadd.f32 %v453_v63, %v347_v57  ;;  %v526_v3 = vpop.f32.mrb[1].mxu1  ;;  %v455_v4 = vpop.f32.mrb[2].mxu0 }
  0xf8   : > { %v595_v5 = vmul.f32 0.2, %v452_v61  ;;  %v527_v6 = vadd.f32 %v526_v3, %v347_v57  ;;  %v456_v7 = vadd.f32 %v455_v4, %v352_v59  ;;  %v528_v8 = vpop.f32.mrb[2].mxu1  ;;  %v457_v9 = vpop.f32.mrb[3].mxu0  ;;  %vm563_vm1 = vcmp.gt.f32.partialorder %v452_v61, 0.0 }
  0xf9   : > { %v597_v10 = vmul.f32 0.2, %v525_v1  ;;  %vm565_vm2 = vcmp.gt.f32.partialorder %v525_v1, 0.0  ;;  %vm564_vm3 = vcmp.gt.f32.partialorder %v454_v2, 0.0  ;;  %v596_v11 = vmul.f32 0.2, %v454_v2 }
  0xfa   : > { %vm567_vm4 = vcmp.gt.f32.partialorder %v456_v7, 0.0  ;;  %v530_v12 = vpop.f32.mrb[3].mxu1  ;;  %v598_v13 = vmul.f32 0.2, %v527_v6  ;;  %v599_v14 = vmul.f32 0.2, %v456_v7  ;;  %v529_v15 = vadd.f32 %v528_v8, %v352_v59 }
  0xfb   : > { %v458_v16 = vadd.f32 %v457_v9, %v352_v59  ;;  %v627_v17 = vsel %vm563_vm1, %v452_v61, %v595_v5  ;;  %vm566_vm5 = vcmp.gt.f32.partialorder %v527_v6, 0.0  ;;  %v531_v18 = vadd.f32 %v530_v12, %v352_v59 }
  0xfc   : > { %v1478_v19 = vsel %vm565_vm2, %v525_v1, %v597_v10  ;;  %v631_v20 = vsel %vm567_vm4, %v456_v7, %v599_v14  ;;  %vm569_vm6 = vcmp.gt.f32.partialorder %v529_v15, 0.0  ;;  %v601_v21 = vmul.f32 0.2, %v529_v15 }
  0xfd   : > { %v461_v22 = vpop.f32.mrb[4].mxu0  ;;  %v667_v24 = vpack.c.bf16 %v631_v20, %v627_v17  ;;  %vm568_vm7 = vcmp.gt.f32.partialorder %v458_v16, 0.0  ;;  %v600_v25 = vmul.f32 0.2, %v458_v16  ;;  %v628_v27 = vsel %vm564_vm3, %v454_v2, %v596_v11 }
  0xfe   : > { %v534_v26 = vpop.f32.mrb[4].mxu1  ;;  %v633_v28 = vsel %vm569_vm6, %v529_v15, %v601_v21  ;;  %v462_v29 = vadd.f32 %v461_v22, %v357_v58  ;;  %v463_v31 = vpop.f32.mrb[5].mxu0  ;;  %v630_v33 = vsel %vm566_vm5, %v527_v6, %v598_v13  ;;  %v602_v35 = vmul.f32 0.2, %v531_v18 }
  0xff   : > { %v535_v30 = vadd.f32 %v534_v26, %v357_v58  ;;  %v536_v32 = vpop.f32.mrb[5].mxu1  ;;  %v669_v34 = vpack.c.bf16 %v633_v28, %v1478_v19  ;;  %v464_v36 = vadd.f32 %v463_v31, %v357_v58  ;;  %v465_v38 = vpop.f32.mrb[6].mxu0  ;;  %vm570_vm8 = vcmp.gt.f32.partialorder %v531_v18, 0.0 }
 0x100   : > { %v537_v37 = vadd.f32 %v536_v32, %v357_v58  ;;  %v538_v39 = vpop.f32.mrb[6].mxu1  ;;  %vm571_vm9 = vcmp.gt.f32.partialorder %v462_v29, 0.0  ;;  %v603_v40 = vmul.f32 0.2, %v462_v29  ;;  %v632_v41 = vsel %vm568_vm7, %v458_v16, %v600_v25  ;;  %v467_v47 = vpop.f32.mrb[7].mxu0 }
 0x101   : > { %vm573_vm10 = vcmp.gt.f32.partialorder %v535_v30, 0.0  ;;  %v605_v42 = vmul.f32 0.2, %v535_v30  ;;  %vm572_vm11 = vcmp.gt.f32.partialorder %v464_v36, 0.0  ;;  %v604_v43 = vmul.f32 0.2, %v464_v36  ;;  %v377_v32 = vpop.permute.xlu0 %376 }
 0x102   : > { %vm574_vm12 = vcmp.gt.f32.partialorder %v537_v37, 0.0  ;;  %v606_v44 = vmul.f32 0.2, %v537_v37  ;;  %v466_v45 = vadd.f32 %v465_v38, %v362_v23  ;;  %v539_v46 = vadd.f32 %v538_v39, %v362_v23  ;;  %v540_v48 = vpop.f32.mrb[7].mxu1 }
 0x103   : > { %v468_v49 = vadd.f32 %v467_v47, %v362_v23  ;;  %v541_v50 = vadd.f32 %v540_v48, %v362_v23  ;;  %v668_v51 = vpack.c.bf16 %v632_v41, %v628_v27  ;;  %v634_v52 = vsel %vm570_vm8, %v531_v18, %v602_v35 }
 0x104   : > { %vm575_vm13 = vcmp.gt.f32.partialorder %v466_v45, 0.0  ;;  %v607_v53 = vmul.f32 0.2, %v466_v45  ;;  %vm577_vm14 = vcmp.gt.f32.partialorder %v539_v46, 0.0  ;;  %v609_v54 = vmul.f32 0.2, %v539_v46 }
 0x105   : > { %v635_v57 = vsel %vm571_vm9, %v462_v29, %v603_v40  ;;  %v1487_v58 = vsel %vm573_vm10, %v535_v30, %v605_v42  ;;  %vm576_vm15 = vcmp.gt.f32.partialorder %v468_v49, 0.0  ;;  %v608_v59 = vmul.f32 0.2, %v468_v49  ;;  %764 = vmatprep.subr.bf16.mxu0 %v668_v51  ;;  %v471_v63 = vpop.f32.mrb[8].mxu0 }
 0x106   : > { %v639_v60 = vsel %vm575_vm13, %v466_v45, %v607_v53  ;;  %v1489_v61 = vsel %vm577_vm14, %v539_v46, %v609_v54  ;;  %vm578_vm0 = vcmp.gt.f32.partialorder %v541_v50, 0.0  ;;  %v670_v62 = vpack.c.bf16 %v634_v52, %v630_v33  ;;  %765 = vmatpush1.bf16.msra.mxu0 %v667_v24  ;;  %v544_v1 = vpop.f32.mrb[8].mxu1  ;;  %v473_v6 = vpop.f32.mrb[9].mxu0 }
 0x107   : > { %v671_v2 = vpack.c.bf16 %v639_v60, %v635_v57  ;;  %v673_v3 = vpack.c.bf16 %v1489_v61, %v1487_v58  ;;  %v472_v4 = vadd.f32 %v471_v63, %v367_v55  ;;  %v545_v5 = vadd.f32 %v544_v1, %v367_v55  ;;  %v546_v7 = vpop.f32.mrb[9].mxu1  ;;  %v475_v11 = vpop.f32.mrb[10].mxu0 }
 0x108   : > { %v610_v8 = vmul.f32 0.2, %v541_v50  ;;  %837 = vmatprep.subr.bf16.mxu1 %v670_v62  ;;  %v1493_v9 = vadd.f32 %v473_v6, %v367_v55  ;;  %v1495_v10 = vadd.f32 %v546_v7, %v367_v55  ;;  %v548_v12 = vpop.f32.mrb[10].mxu1  ;;  %v636_v13 = vsel %vm572_vm11, %v464_v36, %v604_v43  ;;  %v477_v23 = vpop.f32.mrb[11].mxu0 }
 0x109   : > { %838 = vmatpush1.bf16.msra.mxu1 %v669_v34  ;;  %vm579_vm1 = vcmp.gt.f32.partialorder %v472_v4, 0.0  ;;  %v611_v14 = vmul.f32 0.2, %v472_v4  ;;  %v640_v15 = vsel %vm576_vm15, %v468_v49, %v608_v59  ;;  %v638_v16 = vsel %vm574_vm12, %v537_v37, %v606_v44  ;;  %v550_v24 = vpop.f32.mrb[11].mxu1  ;;  %v382_v33 = vpop.permute.xlu1 %381 }
 0x10a   : > { %vm581_vm2 = vcmp.gt.f32.partialorder %v545_v5, 0.0  ;;  %v613_v17 = vmul.f32 0.2, %v545_v5  ;;  %vm580_vm3 = vcmp.gt.f32.partialorder %v1493_v9, 0.0  ;;  %v612_v18 = vmul.f32 0.2, %v1493_v9 }
 0x10b   : > { %v1502_v19 = vsel %vm579_vm1, %v472_v4, %v611_v14  ;;  %v1505_v20 = vmul.f32 0.2, %v1495_v10  ;;  %v476_v21 = vadd.f32 %v475_v11, %v372_v56  ;;  %v549_v22 = vadd.f32 %v548_v12, %v372_v56 }
 0x10c   : > { %v478_v25 = vadd.f32 %v477_v23, %v372_v56  ;;  %v1507_v26 = vadd.f32 %v550_v24, %v372_v56  ;;  %v672_v27 = vpack.c.bf16 %v640_v15, %v636_v13  ;;  %v642_v28 = vsel %vm578_vm0, %v541_v50, %v610_v8  ;;  %v1286_v23 = vld [vmem:[%s1639_s3 + $0x18] sm:$0xff]   ;;  %v694_v24 = vpop.permute.xlu0 %693 }
 0x10d   : > { %v481_v29 = vpop.f32.mrb[12].mxu0  ;;  %vm582_vm4 = vcmp.gt.f32.partialorder %v1495_v10, 0.0  ;;  %vm583_vm5 = vcmp.gt.f32.partialorder %v476_v21, 0.0  ;;  %v615_v30 = vmul.f32 0.2, %v476_v21  ;;  %vm585_vm6 = vcmp.gt.f32.partialorder %v549_v22, 0.0 }
 0x10e   : > { %v617_v31 = vmul.f32 0.2, %v549_v22  ;;  %v1512_v34 = vsel %vm581_vm2, %v545_v5, %v613_v17  ;;  %vm584_vm7 = vcmp.gt.f32.partialorder %v478_v25, 0.0  ;;  %v616_v35 = vmul.f32 0.2, %v478_v25  ;;  %766 = vmatprep.subr.bf16.mxu0 %v672_v27  ;;  %v554_v40 = vpop.f32.mrb[12].mxu1 }
 0x10f   : > { %vm586_vm8 = vcmp.gt.f32.partialorder %v1507_v26, 0.0  ;;  %v647_v36 = vsel %vm583_vm5, %v476_v21, %v615_v30  ;;  %v674_v38 = vpack.c.bf16 %v642_v28, %v638_v16  ;;  %767 = vmatpush1.bf16.msra.mxu0 %v671_v2  ;;  %v482_v39 = vadd.f32 %v481_v29, %v377_v32  ;;  %v483_v41 = vpop.f32.mrb[13].mxu0  ;;  %v556_v46 = vpop.f32.mrb[13].mxu1 }
 0x110   : > { %v649_v37 = vsel %vm585_vm6, %v549_v22, %v617_v31  ;;  %v675_v42 = vpack.c.bf16 %v647_v36, %v1502_v19  ;;  %v555_v44 = vadd.f32 %v554_v40, %v377_v32  ;;  %v484_v45 = vadd.f32 %v483_v41, %v377_v32  ;;  %v485_v47 = vpop.f32.mrb[14].mxu0  ;;  %v558_v51 = vpop.f32.mrb[14].mxu1  ;;  %v1285_v22 = vld [vmem:[%s1639_s3 + $0x10] sm:$0xff]  }
 0x111   : > { %v677_v43 = vpack.c.bf16 %v649_v37, %v1512_v34  ;;  %839 = vmatprep.subr.bf16.mxu1 %v674_v38  ;;  %vm587_vm9 = vcmp.gt.f32.partialorder %v482_v39, 0.0  ;;  %v619_v48 = vmul.f32 0.2, %v482_v39  ;;  %v557_v49 = vadd.f32 %v556_v46, %v377_v32  ;;  %v487_v52 = vpop.f32.mrb[15].mxu0  ;;  %v560_v57 = vpop.f32.mrb[15].mxu1 }
 0x112   : > { %v486_v50 = vadd.f32 %v485_v47, %v382_v33  ;;  %v618_v53 = vmul.f32 0.2, %v1507_v26  ;;  %840 = vmatpush1.bf16.msra.mxu1 %v673_v3  ;;  %vm589_vm10 = vcmp.gt.f32.partialorder %v555_v44, 0.0  ;;  %v621_v54 = vmul.f32 0.2, %v555_v44  ;;  %v704_v47 = vpop.permute.xlu0 %703 }
 0x113   : > { %vm588_vm11 = vcmp.gt.f32.partialorder %v484_v45, 0.0  ;;  %v651_v55 = vsel %vm587_vm9, %v482_v39, %v619_v48  ;;  %v620_v56 = vmul.f32 0.2, %v484_v45  ;;  %vm590_vm12 = vcmp.gt.f32.partialorder %v557_v49, 0.0 }
 0x114   : > { %vm591_vm13 = vcmp.gt.f32.partialorder %v486_v50, 0.0  ;;  %v622_v59 = vmul.f32 0.2, %v557_v49  ;;  %v623_v60 = vmul.f32 0.2, %v486_v50  ;;  %v559_v62 = vadd.f32 %v558_v51, %v382_v33 }
 0x115   : > { %v488_v63 = vadd.f32 %v487_v52, %v382_v33  ;;  %v653_v1 = vsel %vm589_vm10, %v555_v44, %v621_v54  ;;  %v561_v2 = vadd.f32 %v560_v57, %v382_v33  ;;  %v644_v4 = vsel %vm580_vm3, %v1493_v9, %v612_v18 }
 0x116   : > { %v648_v58 = vsel %vm584_vm7, %v478_v25, %v616_v35  ;;  %v655_v61 = vsel %vm591_vm13, %v486_v50, %v623_v60  ;;  %vm593_vm14 = vcmp.gt.f32.partialorder %v559_v62, 0.0  ;;  %v625_v3 = vmul.f32 0.2, %v559_v62  ;;  %v699_v25 = vpop.permute.xlu1 %698 }
 0x117   : > { %vm592_vm15 = vcmp.gt.f32.partialorder %v488_v63, 0.0  ;;  %v679_v5 = vpack.c.bf16 %v655_v61, %v651_v55  ;;  %v624_v6 = vmul.f32 0.2, %v488_v63  ;;  %vm594_vm0 = vcmp.gt.f32.partialorder %v561_v2, 0.0 }
 0x118   : > { %v626_v7 = vmul.f32 0.2, %v561_v2  ;;  %v657_v8 = vsel %vm593_vm14, %v559_v62, %v625_v3  ;;  %v676_v11 = vpack.c.bf16 %v648_v58, %v644_v4  ;;  %v646_v12 = vsel %vm582_vm4, %v1495_v10, %v1505_v20  ;;  %v1283_v10 = vld [vmem:[%s1639_s3] sm:$0xff]   ;;  %v1284_v20 = vld [vmem:[%s1639_s3 + $0x8] sm:$0xff]  }
 0x119   : > { %v650_v9 = vsel %vm586_vm8, %v1507_v26, %v618_v53  ;;  %v681_v13 = vpack.c.bf16 %v657_v8, %v653_v1  ;;  %v652_v15 = vsel %vm588_vm11, %v484_v45, %v620_v56  ;;  %v656_v16 = vsel %vm592_vm15, %v488_v63, %v624_v6 }
 0x11a   : > { %v678_v14 = vpack.c.bf16 %v650_v9, %v646_v12  ;;  %768 = vmatprep.subr.bf16.mxu0 %v676_v11  ;;  %v680_v17 = vpack.c.bf16 %v656_v16, %v652_v15  ;;  %v654_v18 = vsel %vm590_vm12, %v557_v49, %v622_v59  ;;  %v658_v19 = vsel %vm594_vm0, %v561_v2, %v626_v7  ;;  %v709_v52 = vpop.permute.xlu1 %708 }
 0x11b   : > { %769 = vmatpush1.bf16.msra.mxu0 %v675_v42  ;;  %v682_v21 = vpack.c.bf16 %v658_v19, %v654_v18  ;;  %vm751_vm1 = vcmask 523264  }
 0x11c   : > { %841 = vmatprep.subr.bf16.mxu1 %v678_v14  ;;  %770 = vmatprep.subr.bf16.mxu0 %v680_v17 }
 0x11d   : > { %842 = vmatpush1.bf16.msra.mxu1 %v677_v43 }
 0x11e   : > { %843 = vmatprep.subr.bf16.mxu1 %v682_v21 }
 0x11f   : > { %771 = vmatpush1.bf16.msra.mxu0 %v679_v5 }
 0x121   : > { %844 = vmatpush1.bf16.msra.mxu1 %v681_v13 }
 0x122   : > { %1237 = vmatmul.mubr.msk.bf16.vlgmr.msra.gmra.mrb[16].mxu0 %vm751_vm1, %v1283_v10 }
 0x123   : > { %806 = vmatprep.mubr.bf16.mxu0 %v1312_v0 }
 0x124   : > { %1241 = vmatmul.mubr.msk.bf16.vlgmr.msra.gmra.mrb[16].mxu1 %vm751_vm1, %v1283_v10 }
 0x125   : > { %879 = vmatprep.mubr.bf16.mxu1 %v1312_v0 }
 0x12a   : > { %1238 = vmatmul.mubr.msk.bf16.gmra.mrb[20].mxu0 %vm751_vm1, %v1284_v20 }
 0x12b   : > { %816 = vmatprep.mubr.bf16.mxu0 %v1312_v0 }
 0x12c   : > { %1242 = vmatmul.mubr.msk.bf16.gmra.mrb[20].mxu1 %vm751_vm1, %v1284_v20  ;;  %v714_v20 = vpop.permute.xlu0 %713 }
 0x12d   : > { %889 = vmatprep.mubr.bf16.mxu1 %v1312_v0 }
 0x132   : > { %1239 = vmatmul.mubr.msk.bf16.gmra.mrb[24].mxu0 %vm751_vm1, %v1285_v22 }
 0x133   : > { %826 = vmatprep.mubr.bf16.mxu0 %v1312_v0 }
 0x134   : > { %1243 = vmatmul.mubr.msk.bf16.gmra.mrb[24].mxu1 %vm751_vm1, %v1285_v22  ;;  %v719_v22 = vpop.permute.xlu1 %718 }
 0x135   : > { %899 = vmatprep.mubr.bf16.mxu1 %v1312_v0 }
 0x13a   : > { %1240 = vmatmul.mubr.msk.bf16.gmra.mrb[28].mxu0 %vm751_vm1, %v1286_v23 }
 0x13b   : > { %1064 = vmatprep.mubr.bf16.mxu0 %v1312_v0 }
 0x13c   : > { %1244 = vmatmul.mubr.msk.bf16.gmra.mrb[28].mxu1 %vm751_vm1, %v1286_v23 }
 0x13d   : > { %1107 = vmatprep.mubr.bf16.mxu1 %v1312_v0 }
 0x1f5   : > { %v798_v26 = vpop.f32.mrb[16].mxu0 }
 0x1f6   : > { %v799_v27 = vadd.f32 %v798_v26, %v694_v24  ;;  %v800_v29 = vpop.f32.mrb[17].mxu0 }
 0x1f7   : > { %v871_v28 = vpop.f32.mrb[16].mxu1  ;;  %v801_v31 = vadd.f32 %v800_v29, %v694_v24  ;;  %v802_v33 = vpop.f32.mrb[18].mxu0 }
 0x1f8   : > { %v872_v30 = vadd.f32 %v871_v28, %v694_v24  ;;  %v873_v32 = vpop.f32.mrb[17].mxu1  ;;  %v942_v34 = vmul.f32 0.2, %v799_v27  ;;  %v803_v36 = vadd.f32 %v802_v33, %v699_v25  ;;  %v804_v38 = vpop.f32.mrb[19].mxu0  ;;  %vm910_vm2 = vcmp.gt.f32.partialorder %v799_v27, 0.0 }
 0x1f9   : > { %v874_v35 = vadd.f32 %v873_v32, %v694_v24  ;;  %v875_v37 = vpop.f32.mrb[18].mxu1  ;;  %vm911_vm4 = vcmp.gt.f32.partialorder %v801_v31, 0.0  ;;  %v943_v0 = vmul.f32 0.2, %v801_v31  ;;  %v805_v44 = vadd.f32 %v804_v38, %v699_v25 }
 0x1fa   : > { %v944_v39 = vmul.f32 0.2, %v872_v30  ;;  %vm912_vm3 = vcmp.gt.f32.partialorder %v872_v30, 0.0  ;;  %vm914_vm5 = vcmp.gt.f32.partialorder %v803_v36, 0.0  ;;  %v877_v40 = vpop.f32.mrb[19].mxu1  ;;  %v876_v43 = vadd.f32 %v875_v37, %v699_v25 }
 0x1fb   : > { %v945_v41 = vmul.f32 0.2, %v874_v35  ;;  %v946_v42 = vmul.f32 0.2, %v803_v36  ;;  %v974_v45 = vsel %vm910_vm2, %v799_v27, %v942_v34  ;;  %vm913_vm6 = vcmp.gt.f32.partialorder %v874_v35, 0.0 }
 0x1fc   : > { %v878_v46 = vadd.f32 %v877_v40, %v699_v25  ;;  %v1562_v48 = vsel %vm912_vm3, %v872_v30, %v944_v39  ;;  %vm916_vm7 = vcmp.gt.f32.partialorder %v876_v43, 0.0  ;;  %v948_v50 = vmul.f32 0.2, %v876_v43 }
 0x1fd   : > { %v978_v49 = vsel %vm914_vm5, %v803_v36, %v946_v42  ;;  %v808_v51 = vpop.f32.mrb[20].mxu0  ;;  %vm915_vm8 = vcmp.gt.f32.partialorder %v805_v44, 0.0  ;;  %v947_v54 = vmul.f32 0.2, %v805_v44  ;;  %v975_v56 = vsel %vm911_vm4, %v801_v31, %v943_v0 }
 0x1fe   : > { %v1008_v53 = vpack.c.bf16 %v978_v49, %v974_v45  ;;  %v980_v57 = vsel %vm916_vm7, %v876_v43, %v948_v50  ;;  %v809_v59 = vadd.f32 %v808_v51, %v704_v47  ;;  %v810_v62 = vpop.f32.mrb[21].mxu0  ;;  %v977_v1 = vsel %vm913_vm6, %v874_v35, %v945_v41 }
 0x1ff   : > { %v881_v55 = vpop.f32.mrb[20].mxu1  ;;  %v1010_v2 = vpack.c.bf16 %v980_v57, %v1562_v48  ;;  %v949_v4 = vmul.f32 0.2, %v878_v46  ;;  %v811_v58 = vadd.f32 %v810_v62, %v704_v47  ;;  %v812_v3 = vpop.f32.mrb[22].mxu0  ;;  %vm917_vm9 = vcmp.gt.f32.partialorder %v878_v46, 0.0 }
 0x200   : > { %v882_v60 = vadd.f32 %v881_v55, %v704_v47  ;;  %v883_v63 = vpop.f32.mrb[21].mxu1  ;;  %vm918_vm10 = vcmp.gt.f32.partialorder %v809_v59, 0.0  ;;  %v950_v6 = vmul.f32 0.2, %v809_v59  ;;  %v979_v7 = vsel %vm915_vm8, %v805_v44, %v947_v54  ;;  %v814_v14 = vpop.f32.mrb[23].mxu0 }
 0x201   : > { %v884_v61 = vadd.f32 %v883_v63, %v704_v47  ;;  %v885_v5 = vpop.f32.mrb[22].mxu1  ;;  %vm919_vm12 = vcmp.gt.f32.partialorder %v811_v58, 0.0  ;;  %v951_v11 = vmul.f32 0.2, %v811_v58  ;;  %v813_v9 = vadd.f32 %v812_v3, %v709_v52  ;;  %v724_v62 = vpop.permute.xlu0 %723 }
 0x202   : > { %vm920_vm11 = vcmp.gt.f32.partialorder %v882_v60, 0.0  ;;  %v952_v8 = vmul.f32 0.2, %v882_v60  ;;  %v886_v13 = vadd.f32 %v885_v5, %v709_v52  ;;  %v887_v15 = vpop.f32.mrb[23].mxu1  ;;  %v815_v16 = vadd.f32 %v814_v14, %v709_v52  ;;  %v729_v63 = vpop.permute.xlu1 %728 }
 0x203   : > { %vm921_vm13 = vcmp.gt.f32.partialorder %v884_v61, 0.0  ;;  %v953_v12 = vmul.f32 0.2, %v884_v61  ;;  %v888_v17 = vadd.f32 %v887_v15, %v709_v52  ;;  %v1009_v18 = vpack.c.bf16 %v979_v7, %v975_v56 }
 0x204   : > { %v981_v19 = vsel %vm917_vm9, %v878_v46, %v949_v4  ;;  %vm922_vm14 = vcmp.gt.f32.partialorder %v813_v9, 0.0  ;;  %v954_v21 = vmul.f32 0.2, %v813_v9  ;;  %vm924_vm15 = vcmp.gt.f32.partialorder %v886_v13, 0.0 }
 0x205   : > { %v956_v10 = vmul.f32 0.2, %v886_v13  ;;  %v982_v23 = vsel %vm918_vm10, %v809_v59, %v950_v6  ;;  %v1571_v24 = vsel %vm920_vm11, %v882_v60, %v952_v8  ;;  %vm923_vm0 = vcmp.gt.f32.partialorder %v815_v16, 0.0  ;;  %1032 = vmatprep.subr.bf16.mxu0 %v1009_v18  ;;  %v818_v29 = vpop.f32.mrb[24].mxu0 }
 0x206   : > { %v955_v25 = vmul.f32 0.2, %v815_v16  ;;  %v986_v26 = vsel %vm922_vm14, %v813_v9, %v954_v21  ;;  %vm925_vm2 = vcmp.gt.f32.partialorder %v888_v17, 0.0  ;;  %v1011_v28 = vpack.c.bf16 %v981_v19, %v977_v1  ;;  %1033 = vmatpush1.bf16.msra.mxu0 %v1008_v53  ;;  %v820_v35 = vpop.f32.mrb[25].mxu0 }
 0x207   : > { %v1573_v27 = vsel %vm924_vm15, %v886_v13, %v956_v10  ;;  %v891_v30 = vpop.f32.mrb[24].mxu1  ;;  %v1012_v31 = vpack.c.bf16 %v986_v26, %v982_v23  ;;  %v819_v33 = vadd.f32 %v818_v29, %v714_v20  ;;  %v957_v37 = vmul.f32 0.2, %v888_v17  ;;  %v822_v0 = vpop.f32.mrb[26].mxu0 }
 0x208   : > { %v1014_v32 = vpack.c.bf16 %v1573_v27, %v1571_v24  ;;  %v892_v34 = vadd.f32 %v891_v30, %v714_v20  ;;  %v893_v36 = vpop.f32.mrb[25].mxu1  ;;  %1075 = vmatprep.subr.bf16.mxu1 %v1011_v28  ;;  %v1577_v38 = vadd.f32 %v820_v35, %v714_v20  ;;  %v983_v41 = vsel %vm919_vm12, %v811_v58, %v951_v11  ;;  %v824_v51 = vpop.f32.mrb[27].mxu0 }
 0x209   : > { %v1579_v39 = vadd.f32 %v893_v36, %v714_v20  ;;  %v895_v40 = vpop.f32.mrb[26].mxu1  ;;  %1076 = vmatpush1.bf16.msra.mxu1 %v1010_v2  ;;  %vm926_vm3 = vcmp.gt.f32.partialorder %v819_v33, 0.0  ;;  %v958_v42 = vmul.f32 0.2, %v819_v33  ;;  %v987_v43 = vsel %vm923_vm0, %v815_v16, %v955_v25 }
 0x20a   : > { %v985_v44 = vsel %vm921_vm13, %v884_v61, %v953_v12  ;;  %vm928_vm4 = vcmp.gt.f32.partialorder %v892_v34, 0.0  ;;  %v960_v45 = vmul.f32 0.2, %v892_v34  ;;  %vm927_vm5 = vcmp.gt.f32.partialorder %v1577_v38, 0.0  ;;  %v897_v52 = vpop.f32.mrb[27].mxu1 }
 0x20b   : > { %v959_v46 = vmul.f32 0.2, %v1577_v38  ;;  %v1586_v47 = vsel %vm926_vm3, %v819_v33, %v958_v42  ;;  %v1589_v48 = vmul.f32 0.2, %v1579_v39  ;;  %v823_v49 = vadd.f32 %v822_v0, %v719_v22 }
 0x20c   : > { %v896_v50 = vadd.f32 %v895_v40, %v719_v22  ;;  %v825_v53 = vadd.f32 %v824_v51, %v719_v22  ;;  %v1591_v54 = vadd.f32 %v897_v52, %v719_v22  ;;  %v1013_v55 = vpack.c.bf16 %v987_v43, %v983_v41 }
 0x20d   : > { %v989_v56 = vsel %vm925_vm2, %v888_v17, %v957_v37  ;;  %v828_v57 = vpop.f32.mrb[28].mxu0  ;;  %vm929_vm6 = vcmp.gt.f32.partialorder %v1579_v39, 0.0  ;;  %vm930_vm7 = vcmp.gt.f32.partialorder %v823_v49, 0.0  ;;  %v962_v59 = vmul.f32 0.2, %v823_v49 }
 0x20e   : > { %vm932_vm8 = vcmp.gt.f32.partialorder %v896_v50, 0.0  ;;  %v964_v60 = vmul.f32 0.2, %v896_v50  ;;  %v1596_v1 = vsel %vm928_vm4, %v892_v34, %v960_v45  ;;  %vm931_vm9 = vcmp.gt.f32.partialorder %v825_v53, 0.0  ;;  %1034 = vmatprep.subr.bf16.mxu0 %v1013_v55  ;;  %v830_v6 = vpop.f32.mrb[29].mxu0 }
 0x20f   : > { %v963_v2 = vmul.f32 0.2, %v825_v53  ;;  %vm933_vm10 = vcmp.gt.f32.partialorder %v1591_v54, 0.0  ;;  %v994_v4 = vsel %vm930_vm7, %v823_v49, %v962_v59  ;;  %v1015_v61 = vpack.c.bf16 %v989_v56, %v985_v44  ;;  %1035 = vmatpush1.bf16.msra.mxu0 %v1012_v31  ;;  %v901_v5 = vpop.f32.mrb[28].mxu1  ;;  %v832_v13 = vpop.f32.mrb[30].mxu0 }
 0x210   : > { %v996_v58 = vsel %vm932_vm8, %v896_v50, %v964_v60  ;;  %v829_v3 = vadd.f32 %v828_v57, %v724_v62  ;;  %v1016_v7 = vpack.c.bf16 %v994_v4, %v1586_v47  ;;  %v902_v11 = vadd.f32 %v901_v5, %v724_v62  ;;  %v903_v9 = vpop.f32.mrb[29].mxu1  ;;  %v834_v18 = vpop.f32.mrb[31].mxu0 }
 0x211   : > { %v1018_v8 = vpack.c.bf16 %v996_v58, %v1596_v1  ;;  %v831_v12 = vadd.f32 %v830_v6, %v724_v62  ;;  %1077 = vmatprep.subr.bf16.mxu1 %v1015_v61  ;;  %v904_v15 = vadd.f32 %v903_v9, %v724_v62  ;;  %v833_v16 = vadd.f32 %v832_v13, %v729_v63  ;;  %v905_v17 = vpop.f32.mrb[30].mxu1 }
 0x212   : > { %vm934_vm11 = vcmp.gt.f32.partialorder %v829_v3, 0.0  ;;  %v966_v14 = vmul.f32 0.2, %v829_v3  ;;  %v965_v19 = vmul.f32 0.2, %v1591_v54  ;;  %1078 = vmatpush1.bf16.msra.mxu1 %v1014_v32  ;;  %vm936_vm12 = vcmp.gt.f32.partialorder %v902_v11, 0.0 }
 0x213   : > { %v968_v21 = vmul.f32 0.2, %v902_v11  ;;  %vm935_vm13 = vcmp.gt.f32.partialorder %v831_v12, 0.0  ;;  %v967_v20 = vmul.f32 0.2, %v831_v12  ;;  %vm937_vm14 = vcmp.gt.f32.partialorder %v904_v15, 0.0 }
 0x214   : > { %v998_v10 = vsel %vm934_vm11, %v829_v3, %v966_v14  ;;  %vm938_vm15 = vcmp.gt.f32.partialorder %v833_v16, 0.0  ;;  %v907_v22 = vpop.f32.mrb[31].mxu1  ;;  %v969_v23 = vmul.f32 0.2, %v904_v15  ;;  %v970_v25 = vmul.f32 0.2, %v833_v16 }
 0x215   : > { %v906_v26 = vadd.f32 %v905_v17, %v729_v63  ;;  %v835_v28 = vadd.f32 %v834_v18, %v729_v63  ;;  %v1000_v29 = vsel %vm936_vm12, %v902_v11, %v968_v21  ;;  %v908_v30 = vadd.f32 %v907_v22, %v729_v63 }
 0x216   : > { %v991_v31 = vsel %vm927_vm5, %v1577_v38, %v959_v46  ;;  %v995_v24 = vsel %vm931_vm9, %v825_v53, %v963_v2  ;;  %v1002_v27 = vsel %vm938_vm15, %v833_v16, %v970_v25  ;;  %v993_v0 = vsel %vm929_vm6, %v1579_v39, %v1589_v48  ;;  %v1287_v39 = vld [vmem:[%s1641_s5] sm:$0xff]  }
 0x217   : > { %vm940_vm0 = vcmp.gt.f32.partialorder %v906_v26, 0.0  ;;  %v972_v32 = vmul.f32 0.2, %v906_v26  ;;  %vm939_vm2 = vcmp.gt.f32.partialorder %v835_v28, 0.0  ;;  %v1020_v33 = vpack.c.bf16 %v1002_v27, %v998_v10 }
 0x218   : > { %v971_v34 = vmul.f32 0.2, %v835_v28  ;;  %vm941_vm3 = vcmp.gt.f32.partialorder %v908_v30, 0.0  ;;  %v973_v35 = vmul.f32 0.2, %v908_v30  ;;  %v1017_v37 = vpack.c.bf16 %v995_v24, %v991_v31 }
 0x219   : > { %v1004_v36 = vsel %vm940_vm0, %v906_v26, %v972_v32  ;;  %v997_v38 = vsel %vm933_vm10, %v1591_v54, %v965_v19  ;;  %v999_v42 = vsel %vm935_vm13, %v831_v12, %v967_v20  ;;  %v1001_v45 = vsel %vm937_vm14, %v904_v15, %v969_v23 }
 0x21a   : > { %v1022_v40 = vpack.c.bf16 %v1004_v36, %v1000_v29  ;;  %v1019_v41 = vpack.c.bf16 %v997_v38, %v993_v0  ;;  %v1003_v43 = vsel %vm939_vm2, %v835_v28, %v971_v34  ;;  %1036 = vmatprep.subr.bf16.mxu0 %v1017_v37  ;;  %v1005_v46 = vsel %vm941_vm3, %v908_v30, %v973_v35 }
 0x21b   : > { %v1021_v44 = vpack.c.bf16 %v1003_v43, %v999_v42  ;;  %1037 = vmatpush1.bf16.msra.mxu0 %v1016_v7  ;;  %v1023_v47 = vpack.c.bf16 %v1005_v46, %v1001_v45 }
 0x21c   : > { %1079 = vmatprep.subr.bf16.mxu1 %v1019_v41 }
 0x21d   : > { %1080 = vmatpush1.bf16.msra.mxu1 %v1018_v8  ;;  %1038 = vmatprep.subr.bf16.mxu0 %v1021_v44 }
 0x21e   : > { %1081 = vmatprep.subr.bf16.mxu1 %v1023_v47 }
 0x21f   : > { %1039 = vmatpush1.bf16.msra.mxu0 %v1020_v33 }
 0x221   : > { %1082 = vmatpush1.bf16.msra.mxu1 %v1022_v40 }
 0x222   : > { %1246 = vmatmul.mubr.msk.bf16.vlgmr.msra.gmra.mrb[32].mxu0 %vm751_vm1, %v1287_v39 }
 0x224   : > { %1247 = vmatmul.mubr.msk.bf16.vlgmr.msra.gmra.mrb[32].mxu1 %vm751_vm1, %v1287_v39 }
 0x2f5   : > { %v1066_v48 = vpop.f32.mrb[32].mxu0 }
 0x2f6   : > { %1118 = vst [vmem:[%s289_s18] sm:$0xff] %v1066_v48  ;;  %v1068_v50 = vpop.f32.mrb[33].mxu0 }
 0x2f7   : > { %v1109_v49 = vpop.f32.mrb[32].mxu1  ;;  %1119 = vst [vmem:[%s289_s18 + $0x8] sm:$0xff] %v1068_v50  ;;  %v1070_v52 = vpop.f32.mrb[34].mxu0 }
 0x2f8   : > { %1120 = vst [vmem:[%s289_s18 + $0x10] sm:$0xff] %v1109_v49  ;;  %v1111_v51 = vpop.f32.mrb[33].mxu1  ;;  %1122 = vst [vmem:[%s289_s18 + $0x20] sm:$0xff] %v1070_v52  ;;  %v1072_v54 = vpop.f32.mrb[35].mxu0 }
 0x2f9   : > { %1121 = vst [vmem:[%s289_s18 + $0x18] sm:$0xff] %v1111_v51  ;;  %v1113_v53 = vpop.f32.mrb[34].mxu1  ;;  %1123 = vst [vmem:[%s289_s18 + $0x28] sm:$0xff] %v1072_v54 }
 0x2fa   : > { %1124 = vst [vmem:[%s289_s18 + $0x30] sm:$0xff] %v1113_v53  ;;  %v1115_v55 = vpop.f32.mrb[35].mxu1 }
 0x2fb   : > { %1125 = vst [vmem:[%s289_s18 + $0x38] sm:$0xff] %v1115_v55 }
 0x2fc PF: > { %s16_s23 = sadd.s32 1, %s1310_s23   ;;  %s1643_s21 = smov %s1306_s22 }
 0x2fd   : > { %p13_p5 = scmp.ge.s32.totalorder %s16_s23, 4   ;;  %s1644_s22 = smov %s1646_s24 }
 0x2ff   :  { %15 = sbr.rel (!%p13_p5) target bundleno = 2 (0x2), region = 74 }

</bundles_post_ra>
